<compile_context>
chip_gen: v6e
topology: v6e:2x2x1
jax: 0.10.0
libtpu: 0.0.40
codegen_flags: <defaults>
</compile_context>

<pallas_src>
import jax
import jax.numpy as jnp
from jax.experimental import pallas as pl
from jax.experimental.pallas import tpu as pltpu

ADD_TO_EDGE_SCORE = 0.5
NEG = -1e30  # "minus infinity" that stays NaN-free under subtraction


def _masks_and_scores(p_t, srcr_ref, dstr_ref):
    """Build the [N, Et] one-hot masks and the raw edge scores e_T [2, Et]."""
    n_nodes = p_t.shape[1]
    e_tile = srcr_ref.shape[1]
    node_ids = jax.lax.broadcasted_iota(jnp.int32, (n_nodes, e_tile), 0)
    msrc_t = node_ids == srcr_ref[...]          # [N, Et] bool (src one-hot^T)
    mdst_t = node_ids == dstr_ref[...]          # [N, Et] bool (dst one-hot^T)
    # e_T = p_src^T @ onehot_src^T + (p_dst^T + b) @ onehot_dst^T   -> [2, Et]
    e_t = (jnp.dot(p_t[0:2, :], msrc_t.astype(jnp.float32),
                   preferred_element_type=jnp.float32)
           + jnp.dot(p_t[2:4, :], mdst_t.astype(jnp.float32),
                     preferred_element_type=jnp.float32))
    return mdst_t, e_t


def _edger_max_kernel(wT_ref, xT_ref, bcol_ref, srcr_ref, dstr_ref,
                      pT_out, m_out, pT_s, m_s):
    """Pass 1: project nodes once (tile 0) and accumulate per-dst-node max."""
    t = pl.program_id(0)

    @pl.when(t == 0)
    def _init():
        # p_T = [W_src; W_dst] @ x^T  (+ bias folded into the dst half)
        pT_s[...] = (jnp.dot(wT_ref[...], xT_ref[...],
                             preferred_element_type=jnp.float32)
                     + bcol_ref[...])
        m_s[...] = jnp.full(m_s.shape, NEG, jnp.float32)

    mdst_t, e_t = _masks_and_scores(pT_s[...], srcr_ref, dstr_ref)

    # Per-group max (bool-masked reduce; mask reused for both feature columns).
    neg = jnp.float32(NEG)
    tmax0 = jnp.max(jnp.where(mdst_t, e_t[0:1, :], neg), axis=1, keepdims=True)
    tmax1 = jnp.max(jnp.where(mdst_t, e_t[1:2, :], neg), axis=1, keepdims=True)
    m_s[...] = jnp.maximum(m_s[...], jnp.concatenate([tmax0, tmax1], axis=1))

    @pl.when(t == pl.num_programs(0) - 1)
    def _finalize():
        pT_out[...] = pT_s[...]
        m_out[...] = m_s[...]


def _edger_sum_kernel(pT_ref, mT_ref, srcr_ref, dstr_ref, dstc_ref,
                      l_out, l_s):
    """Pass 2: accumulate per-dst-node sum of exp(e - group_max) on the MXU."""
    t = pl.program_id(0)

    @pl.when(t == 0)
    def _init():
        l_s[...] = jnp.zeros(l_s.shape, jnp.float32)

    mdst_t, e_t = _masks_and_scores(pT_ref[...], srcr_ref, dstr_ref)
    mdst_t_f = mdst_t.astype(jnp.float32)

    # Gather each edge's group max: [2,N] @ [N,Et]  (MXU).
    pmax_t = jnp.dot(mT_ref[...], mdst_t_f, preferred_element_type=jnp.float32)
    p_t = jnp.exp(e_t - pmax_t)                                   # [2, Et]

    # Scatter-add exp() into per-node sums: [2,Et] @ [Et,N]  (MXU).
    n_nodes = pT_ref.shape[1]
    e_tile = srcr_ref.shape[1]
    node_ids = jax.lax.broadcasted_iota(jnp.int32, (e_tile, n_nodes), 1)
    mdst = (node_ids == dstc_ref[...]).astype(jnp.float32)        # [Et, N]
    l_s[...] += jnp.dot(p_t, mdst, preferred_element_type=jnp.float32)

    @pl.when(t == pl.num_programs(0) - 1)
    def _finalize():
        l_out[...] = l_s[...]


def _edger_norm_kernel(pT_ref, mT_ref, lT_ref, srcr_ref, dstr_ref, out_ref):
    """Pass 3: per-edge normalize; lane-dense [2, Et] output block."""
    mdst_t, e_t = _masks_and_scores(pT_ref[...], srcr_ref, dstr_ref)
    mdst_t_f = mdst_t.astype(jnp.float32)
    pmax_t = jnp.dot(mT_ref[...], mdst_t_f, preferred_element_type=jnp.float32)
    psum_t = jnp.dot(lT_ref[...], mdst_t_f, preferred_element_type=jnp.float32)
    out_ref[...] = (jnp.exp(e_t - pmax_t) / (psum_t + 1e-16)
                    + ADD_TO_EDGE_SCORE)


def edger_forward(x, edge_index, batch, weight, bias, *, e_tile=256):
    """Pallas-backed Edger.forward. Returns (x, edge_index, batch, edge_scores)."""
    n, c = x.shape
    e = edge_index.shape[1]
    f32 = jnp.float32

    # e_tile bounds the [N, e_tile] one-hot working set. 256 fits comfortably on
    # v5e/v6e (128 MiB VMEM) for moderate N; halve it for v7x (64 MiB) or very
    # large N.
    num_tiles = pl.cdiv(e, e_tile)
    e_pad = num_tiles * e_tile

    # Layout plumbing (wrapper-side reshapes/transposes only).
    x_t = x.T.astype(f32)                                               # [C, N]
    w_t = jnp.concatenate([weight[:, :c], weight[:, c:]], axis=0).astype(f32)  # [4, C]
    b_col = jnp.concatenate([jnp.zeros((2, 1), f32),
                             bias.astype(f32).reshape(2, 1)], axis=0)   # [4, 1]

    src = edge_index[0].astype(jnp.int32)
    dst = edge_index[1].astype(jnp.int32)
    if e_pad > e:
        fill = jnp.full((e_pad - e,), n, jnp.int32)   # sentinel: matches no node
        src = jnp.concatenate([src, fill])
        dst = jnp.concatenate([dst, fill])
    src_row = src.reshape(1, e_pad)     # lane-dense index rows
    dst_row = dst.reshape(1, e_pad)
    dst_col = dst.reshape(e_pad, 1)     # only used by the pass-2 scatter matmul

    const2 = lambda shape: pl.BlockSpec(shape, lambda t: (0, 0))
    row_spec = pl.BlockSpec((1, e_tile), lambda t: (0, t))

    # ---- Pass 1: projection (tile 0) + per-dst-node max ------------------
    p_t, m = pl.pallas_call(
        _edger_max_kernel,
        grid=(num_tiles,),
        in_specs=[const2((4, c)), const2((c, n)), const2((4, 1)),
                  row_spec, row_spec],
        out_specs=(const2((4, n)), const2((n, 2))),
        out_shape=(jax.ShapeDtypeStruct((4, n), f32),
                   jax.ShapeDtypeStruct((n, 2), f32)),
        scratch_shapes=[pltpu.VMEM((4, n), f32), pltpu.VMEM((n, 2), f32)],
        compiler_params=pltpu.CompilerParams(
            dimension_semantics=("arbitrary",)),
    )(w_t, x_t, b_col, src_row, dst_row)

    m_t = m.T                                                           # [2, N]

    # ---- Pass 2: per-dst-node sum of exp(e - max) -------------------------
    l_t = pl.pallas_call(
        _edger_sum_kernel,
        grid=(num_tiles,),
        in_specs=[const2((4, n)), const2((2, n)),
                  row_spec, row_spec,
                  pl.BlockSpec((e_tile, 1), lambda t: (t, 0))],
        out_specs=const2((2, n)),
        out_shape=jax.ShapeDtypeStruct((2, n), f32),
        scratch_shapes=[pltpu.VMEM((2, n), f32)],
        compiler_params=pltpu.CompilerParams(
            dimension_semantics=("arbitrary",)),
    )(p_t, m_t, src_row, dst_row, dst_col)

    # ---- Pass 3: per-edge normalize, lane-dense [2, E] output -------------
    out_t = pl.pallas_call(
        _edger_norm_kernel,
        grid=(num_tiles,),
        in_specs=[const2((4, n)), const2((2, n)), const2((2, n)),
                  row_spec, row_spec],
        out_specs=pl.BlockSpec((2, e_tile), lambda t: (0, t)),
        out_shape=jax.ShapeDtypeStruct((2, e_pad), f32),
        compiler_params=pltpu.CompilerParams(
            dimension_semantics=("parallel",)),
    )(p_t, m_t, l_t, src_row, dst_row)

    edge_scores = out_t[:, :e].T                                        # [E, 2]
    return x, edge_index, batch, edge_scores


def edger_reference(x, edge_index, weight, bias):
    """Pure-JAX reference of the forward pass (for the correctness check)."""
    src, dst = edge_index[0], edge_index[1]
    n = x.shape[0]
    e = jnp.concatenate([x[src], x[dst]], axis=-1) @ weight.T + bias    # [E, 2]
    gmax = jax.ops.segment_max(e, dst, num_segments=n)                  # [N, 2]
    gmax = jnp.where(jnp.isfinite(gmax), gmax, 0.0)
    ex = jnp.exp(e - gmax[dst])
    gsum = jax.ops.segment_sum(ex, dst, num_segments=n)                 # [N, 2]
    return ex / (gsum[dst] + 1e-16) + ADD_TO_EDGE_SCORE


if __name__ == "__main__":
    key = jax.random.PRNGKey(0)
    k_x, k_ei, k_w, k_b = jax.random.split(key, 4)

    num_nodes = 16      # N
    in_channels = 8     # C
    num_edges = 32      # E

    x = jax.random.normal(k_x, (num_nodes, in_channels), dtype=jnp.float32)
    edge_index = jax.random.randint(k_ei, (2, num_edges), 0, num_nodes,
                                    dtype=jnp.int32)
    batch = jnp.zeros((num_nodes,), dtype=jnp.int32)

    # Deterministic Linear(2C, 2) params (PyTorch-style uniform(-k, k) init).
    bound = 1.0 / jnp.sqrt(2.0 * in_channels)
    weight = jax.random.uniform(k_w, (2, 2 * in_channels), minval=-bound,
                                maxval=bound, dtype=jnp.float32)
    bias = jax.random.uniform(k_b, (2,), minval=-bound, maxval=bound,
                              dtype=jnp.float32)

    x_out, ei_out, batch_out, scores = edger_forward(x, edge_index, batch,
                                                     weight, bias)
    jax.block_until_ready(scores)

    ref_scores = edger_reference(x, edge_index, weight, bias)
    assert scores.shape == (num_edges, 2)
    assert jnp.allclose(scores, ref_scores, atol=1e-5, rtol=1e-5), (
        "mismatch vs reference")

    print("KERNEL_OK")
</pallas_src>

<mosaic_0001>
module attributes {stable_mosaic.version = 11 : i64} {
  func.func @_edger_max_kernel(%arg0: i32, %arg1: memref<4x8xf32, #tpu.memory_space<vmem>>, %arg2: memref<8x16xf32, #tpu.memory_space<vmem>>, %arg3: memref<4x1xf32, #tpu.memory_space<vmem>>, %arg4: memref<1x256xi32, #tpu.memory_space<vmem>>, %arg5: memref<1x256xi32, #tpu.memory_space<vmem>>, %arg6: memref<4x16xf32, #tpu.memory_space<vmem>>, %arg7: memref<16x2xf32, #tpu.memory_space<vmem>>, %arg8: memref<4x16xf32, #tpu.memory_space<vmem>>, %arg9: memref<16x2xf32, #tpu.memory_space<vmem>>) attributes {dimension_semantics = [#tpu.dimension_semantics<arbitrary>], iteration_bounds = array<i64: 1>, scalar_prefetch = 0 : i64, scratch_operands = 2 : i64, tpu.core_type = #tpu.core_type<tc>, window_params = [{pipeline_mode = #tpu.pipeline_mode<synchronous>, transform_indices = @transform_0, window_bounds = array<i64: 4, 8>}, {pipeline_mode = #tpu.pipeline_mode<synchronous>, transform_indices = @transform_1, window_bounds = array<i64: 8, 16>}, {pipeline_mode = #tpu.pipeline_mode<synchronous>, transform_indices = @transform_2, window_bounds = array<i64: 4, 1>}, {transform_indices = @transform_3, window_bounds = array<i64: 1, 256>}, {transform_indices = @transform_4, window_bounds = array<i64: 1, 256>}, {pipeline_mode = #tpu.pipeline_mode<synchronous>, transform_indices = @transform_5, window_bounds = array<i64: 4, 16>}, {pipeline_mode = #tpu.pipeline_mode<synchronous>, transform_indices = @transform_6, window_bounds = array<i64: 16, 2>}]} {
    %c0_i32 = arith.constant 0 : i32
    %0 = arith.cmpi eq, %arg0, %c0_i32 : i32
    %1 = arith.extui %0 : i1 to i32
    %c0_i32_0 = arith.constant 0 : i32
    %2 = arith.cmpi ne, %1, %c0_i32_0 : i32
    scf.if %2 {
      %c0_17 = arith.constant 0 : index
      %c0_18 = arith.constant 0 : index
      %41 = vector.load %arg1[%c0_17, %c0_18] : memref<4x8xf32, #tpu.memory_space<vmem>>, vector<4x8xf32>
      %c0_19 = arith.constant 0 : index
      %c0_20 = arith.constant 0 : index
      %42 = vector.load %arg2[%c0_19, %c0_20] : memref<8x16xf32, #tpu.memory_space<vmem>>, vector<8x16xf32>
      %cst_21 = arith.constant dense<0.000000e+00> : vector<4x16xf32>
      %43 = tpu.matmul %41, %42, %cst_21 {dimension_numbers = #tpu.dot_dimension_numbers<[1], [0], [0], [1], [0, 0, 1, 1], [], []>} : vector<4x8xf32>, vector<8x16xf32>, vector<4x16xf32> -> vector<4x16xf32>
      %c0_22 = arith.constant 0 : index
      %c0_23 = arith.constant 0 : index
      %44 = vector.load %arg3[%c0_22, %c0_23] : memref<4x1xf32, #tpu.memory_space<vmem>>, vector<4x1xf32>
      %45 = vector.broadcast %44 : vector<4x1xf32> to vector<4x16xf32>
      %46 = arith.addf %43, %45 : vector<4x16xf32>
      %c0_24 = arith.constant 0 : index
      %c0_25 = arith.constant 0 : index
      %47 = vector.load %arg8[%c0_24, %c0_25] : memref<4x16xf32, #tpu.memory_space<vmem>>, vector<4x16xf32>
      tpu.vector_store %arg8[%c0_24, %c0_25], %46 {strides = array<i32>} : memref<4x16xf32, #tpu.memory_space<vmem>>, vector<4x16xf32>,
      %cst_26 = arith.constant -1.000000e+30 : f32
      %48 = vector.broadcast %cst_26 : f32 to vector<16x2xf32>
      %c0_27 = arith.constant 0 : index
      %c0_28 = arith.constant 0 : index
      %49 = vector.load %arg9[%c0_27, %c0_28] : memref<16x2xf32, #tpu.memory_space<vmem>>, vector<16x2xf32>
      tpu.vector_store %arg9[%c0_27, %c0_28], %48 {strides = array<i32>} : memref<16x2xf32, #tpu.memory_space<vmem>>, vector<16x2xf32>,
    } else {
    }
    %c0 = arith.constant 0 : index
    %c0_1 = arith.constant 0 : index
    %3 = vector.load %arg8[%c0, %c0_1] : memref<4x16xf32, #tpu.memory_space<vmem>>, vector<4x16xf32>
    %4 = tpu.iota {dimensions = array<i32: 0>} : vector<16x256xi32>
    %c0_2 = arith.constant 0 : index
    %c0_3 = arith.constant 0 : index
    %5 = vector.load %arg4[%c0_2, %c0_3] : memref<1x256xi32, #tpu.memory_space<vmem>>, vector<1x256xi32>
    %6 = vector.broadcast %5 : vector<1x256xi32> to vector<16x256xi32>
    %7 = arith.cmpi eq, %4, %6 : vector<16x256xi32>
    %c0_4 = arith.constant 0 : index
    %c0_5 = arith.constant 0 : index
    %8 = vector.load %arg5[%c0_4, %c0_5] : memref<1x256xi32, #tpu.memory_space<vmem>>, vector<1x256xi32>
    %9 = vector.broadcast %8 : vector<1x256xi32> to vector<16x256xi32>
    %10 = arith.cmpi eq, %4, %9 : vector<16x256xi32>
    %11 = vector.extract_strided_slice %3 {offsets = [0, 0], sizes = [2, 16], strides = [1, 1]} : vector<4x16xf32> to vector<2x16xf32>
    %12 = arith.extui %7 : vector<16x256xi1> to vector<16x256xi32>
    %13 = arith.sitofp %12 : vector<16x256xi32> to vector<16x256xf32>
    %cst = arith.constant dense<0.000000e+00> : vector<2x256xf32>
    %14 = tpu.matmul %11, %13, %cst {dimension_numbers = #tpu.dot_dimension_numbers<[1], [0], [0], [1], [0, 0, 1, 1], [], []>} : vector<2x16xf32>, vector<16x256xf32>, vector<2x256xf32> -> vector<2x256xf32>
    %15 = vector.extract_strided_slice %3 {offsets = [2, 0], sizes = [2, 16], strides = [1, 1]} : vector<4x16xf32> to vector<2x16xf32>
    %16 = arith.extui %10 : vector<16x256xi1> to vector<16x256xi32>
    %17 = arith.sitofp %16 : vector<16x256xi32> to vector<16x256xf32>
    %cst_6 = arith.constant dense<0.000000e+00> : vector<2x256xf32>
    %18 = tpu.matmul %15, %17, %cst_6 {dimension_numbers = #tpu.dot_dimension_numbers<[1], [0], [0], [1], [0, 0, 1, 1], [], []>} : vector<2x16xf32>, vector<16x256xf32>, vector<2x256xf32> -> vector<2x256xf32>
    %19 = arith.addf %14, %18 : vector<2x256xf32>
    %20 = vector.extract_strided_slice %19 {offsets = [0, 0], sizes = [1, 256], strides = [1, 1]} : vector<2x256xf32> to vector<1x256xf32>
    %cst_7 = arith.constant -1.000000e+30 : f32
    %21 = vector.shape_cast %20 : vector<1x256xf32> to vector<1x256xf32>
    %22 = vector.broadcast %21 : vector<1x256xf32> to vector<16x256xf32>
    %23 = vector.broadcast %cst_7 : f32 to vector<16x256xf32>
    %24 = arith.select %10, %22, %23 : vector<16x256xi1>, vector<16x256xf32>
    %cst_8 = arith.constant dense<0xFF800000> : vector<16xf32>
    %25 = vector.multi_reduction <maximumf>, %24, %cst_8 [1] : vector<16x256xf32> to vector<16xf32>
    %26 = vector.shape_cast %25 : vector<16xf32> to vector<16x1xf32>
    %27 = vector.extract_strided_slice %19 {offsets = [1, 0], sizes = [1, 256], strides = [1, 1]} : vector<2x256xf32> to vector<1x256xf32>
    %cst_9 = arith.constant -1.000000e+30 : f32
    %28 = vector.shape_cast %27 : vector<1x256xf32> to vector<1x256xf32>
    %29 = vector.broadcast %28 : vector<1x256xf32> to vector<16x256xf32>
    %30 = vector.broadcast %cst_9 : f32 to vector<16x256xf32>
    %31 = arith.select %10, %29, %30 : vector<16x256xi1>, vector<16x256xf32>
    %cst_10 = arith.constant dense<0xFF800000> : vector<16xf32>
    %32 = vector.multi_reduction <maximumf>, %31, %cst_10 [1] : vector<16x256xf32> to vector<16xf32>
    %33 = vector.shape_cast %32 : vector<16xf32> to vector<16x1xf32>
    %c0_11 = arith.constant 0 : index
    %c0_12 = arith.constant 0 : index
    %34 = vector.load %arg9[%c0_11, %c0_12] : memref<16x2xf32, #tpu.memory_space<vmem>>, vector<16x2xf32>
    %35 = tpu.concatenate %26, %33 in 1 : vector<16x1xf32>, vector<16x1xf32> -> vector<16x2xf32>
    %36 = arith.maximumf %34, %35 : vector<16x2xf32>
    %c0_13 = arith.constant 0 : index
    %c0_14 = arith.constant 0 : index
    %37 = vector.load %arg9[%c0_13, %c0_14] : memref<16x2xf32, #tpu.memory_space<vmem>>, vector<16x2xf32>
    tpu.vector_store %arg9[%c0_13, %c0_14], %36 {strides = array<i32>} : memref<16x2xf32, #tpu.memory_space<vmem>>, vector<16x2xf32>,
    %c0_i32_15 = arith.constant 0 : i32
    %38 = arith.cmpi eq, %arg0, %c0_i32_15 : i32
    %39 = arith.extui %38 : i1 to i32
    %c0_i32_16 = arith.constant 0 : i32
    %40 = arith.cmpi ne, %39, %c0_i32_16 : i32
    scf.if %40 {
      %c0_17 = arith.constant 0 : index
      %c0_18 = arith.constant 0 : index
      %41 = vector.load %arg8[%c0_17, %c0_18] : memref<4x16xf32, #tpu.memory_space<vmem>>, vector<4x16xf32>
      %c0_19 = arith.constant 0 : index
      %c0_20 = arith.constant 0 : index
      %42 = vector.load %arg6[%c0_19, %c0_20] : memref<4x16xf32, #tpu.memory_space<vmem>>, vector<4x16xf32>
      tpu.vector_store %arg6[%c0_19, %c0_20], %41 {strides = array<i32>} : memref<4x16xf32, #tpu.memory_space<vmem>>, vector<4x16xf32>,
      %c0_21 = arith.constant 0 : index
      %c0_22 = arith.constant 0 : index
      %43 = vector.load %arg9[%c0_21, %c0_22] : memref<16x2xf32, #tpu.memory_space<vmem>>, vector<16x2xf32>
      %c0_23 = arith.constant 0 : index
      %c0_24 = arith.constant 0 : index
      %44 = vector.load %arg7[%c0_23, %c0_24] : memref<16x2xf32, #tpu.memory_space<vmem>>, vector<16x2xf32>
      tpu.vector_store %arg7[%c0_23, %c0_24], %43 {strides = array<i32>} : memref<16x2xf32, #tpu.memory_space<vmem>>, vector<16x2xf32>,
    } else {
    }
    return
  }
  func.func @transform_0(%arg0: i32) -> (i32, i32) {
    %c0_i32 = arith.constant 0 : i32
    %c0_i32_0 = arith.constant 0 : i32
    %c0_i32_1 = arith.constant 0 : i32
    return %c0_i32, %c0_i32_0 : i32, i32
  }
  func.func @transform_1(%arg0: i32) -> (i32, i32) {
    %c0_i32 = arith.constant 0 : i32
    %c0_i32_0 = arith.constant 0 : i32
    %c0_i32_1 = arith.constant 0 : i32
    return %c0_i32, %c0_i32_0 : i32, i32
  }
  func.func @transform_2(%arg0: i32) -> (i32, i32) {
    %c0_i32 = arith.constant 0 : i32
    %c0_i32_0 = arith.constant 0 : i32
    %c0_i32_1 = arith.constant 0 : i32
    return %c0_i32, %c0_i32_0 : i32, i32
  }
  func.func @transform_3(%arg0: i32) -> (i32, i32) {
    %c0_i32 = arith.constant 0 : i32
    %c0_i32_0 = arith.constant 0 : i32
    return %c0_i32, %arg0 : i32, i32
  }
  func.func @transform_4(%arg0: i32) -> (i32, i32) {
    %c0_i32 = arith.constant 0 : i32
    %c0_i32_0 = arith.constant 0 : i32
    return %c0_i32, %arg0 : i32, i32
  }
  func.func @transform_5(%arg0: i32) -> (i32, i32) {
    %c0_i32 = arith.constant 0 : i32
    %c0_i32_0 = arith.constant 0 : i32
    %c0_i32_1 = arith.constant 0 : i32
    return %c0_i32, %c0_i32_0 : i32, i32
  }
  func.func @transform_6(%arg0: i32) -> (i32, i32) {
    %c0_i32 = arith.constant 0 : i32
    %c0_i32_0 = arith.constant 0 : i32
    %c0_i32_1 = arith.constant 0 : i32
    return %c0_i32, %c0_i32_0 : i32, i32
  }
}

</mosaic_0001>

<bundles_post_ra>
// kernel: tpu_custom_call.1
= control target key start
LH: loop header
LB: loop body
LE: loop exit
PB: predicated region body
PF: predicated region fallthrough
CT: control target
= control target key end

     0   :  { %12 = vsyncpa [#allocation5], 0  ;;  %s558_s0 = inlined_call_operand.vmem [shape: f32[4,8], index: 0, kind: input, shape index: {}]   ;;  %s559_s1 = inlined_call_operand.hbm [shape: f32[8,16], index: 1, kind: input, shape index: {}]   ;;  %s560_s2 = inlined_call_operand.vmem [shape: f32[4,1], index: 2, kind: input, shape index: {}]   ;;  %s561_s3 = inlined_call_operand.vmem [shape: s32[1,256], index: 3, kind: input, shape index: {}]   ;;  %s562_s4 = inlined_call_operand.vmem [shape: s32[1,256], index: 4, kind: input, shape index: {}]   ;;  %s563_s5 = inlined_call_operand.hbm [shape: f32[4,16], index: 5, kind: output, shape index: {0}]   ;;  %s564_s6 = inlined_call_operand.vmem [shape: f32[16,2], index: 6, kind: output, shape index: {1}]  }
   0x1   :  { %13 = vsyncpa [#allocation6], 0  ;;  %s474_s21 = smov [#allocation4]  }
   0x2   :  { %s22_s22 = sshll.u32 %s474_s21, 4  ;;  %s23_s22 = int_to_ptr.vmem [resolvable:$true] %s22_s22 }
   0x3   :  { %s438_s23 = scalar_lea.vmem %s23_s22, 128  ;;  %p443_p1 = scmp.lt.s32.totalorder %s23_s22, %s23_s22 }
   0x4   :  { %p439_p0 = scmp.ne.s32.totalorder %s23_s22, %s438_s23  ;;  %p444_p2 = scmp.lt.s32.totalorder %s438_s23, %s438_s23 }
   0x6   :  { %p445_p3 = por %p444_p2, %p443_p1 }
   0x8   :  { %p446_p4 = pnand %p445_p3, %p439_p0 }
   0xa   :  { %449 = shalt.err (!%p446_p4)
}
   0xb   :  { %25 = dma.hbm_to_vmem [thread:$0]  %s559_s1, 128, %s23_s22, [#allocation5]  }
   0xc   :  { %470 = dma.done.wait [#allocation5], 128  }
   0xd   :  { %471 = vsyncadd [#allocation5], 4294967168  ;;  %v475_v0 = vmov 0.0   ;;  %vm476_vm0 = vmmov 0   ;;  %v477_v1 = vmov 0   ;;  %vm47_vm1 = vcmask 64512  }
   0xe   :  { %417 = vmatprep.subr.mxu0 %v475_v0  ;;  %419 = vmatprep.mubr.msk.f32.mxu0 %vm476_vm0, %v475_v0  ;;  %v40_v2 = vld [vmem:[#allocation4] sm:$0xff]  ;;  %v39_v3 = vld [vmem:[%s558_s0] sm:$0xf]  ;;  %v127_v5 = vlaneseq  ;;  %v478_v16 = vmov 1.0   ;;  %vm121_vm10 = vcmask 125952   ;;  %vm174_vm11 = vcmask 130048  }
   0xf   :  { %429 = vset.pattern.permute.xlu0 %v477_v1  ;;  %241 = vmatprep.mubr.f32.mxu1 %v475_v0  ;;  %v41_v4 = vld [vmem:[%s560_s2] sm:$0xf]  ;;  %vm123_vm12 = vcmask 15360   ;;  %v479_v46 = vmov -1e+30   ;;  %s480_s2 = smov [#allocation7]  }
  0x10   :  { %418 = vmatpush3.msra.mxu0 %v40_v2  ;;  %44 = vperm.xlu0 %429, %v41_v4   ;;  %v128_v6 = vshrl.u32 %v127_v5, 7  ;;  %v130_v9 = vld [vmem:[%s561_s3] sm:$0x3]  ;;  %124 = vst.msk [vmem:[#allocation3] sm:$0xff] %vm123_vm12, %v479_v46  ;;  %125 = vst.msk [vmem:[#allocation3 + $0x8] sm:$0xff] %vm123_vm12, %v479_v46  ;;  %s383_s3 = sshll.u32 %s480_s2, 4  ;;  %s384_s3 = int_to_ptr.vmem [resolvable:$true] %s383_s3 }
  0x11   :  { %420 = vmatmul.mubr.msk.f32.vlgmr.msra.gmra.mxu0 %vm47_vm1, %v39_v3  ;;  %v143_v12 = vld [vmem:[%s562_s4] sm:$0x3]  ;;  %s450_s4 = scalar_lea.vmem %s384_s3, 64  ;;  %p455_p6 = scmp.lt.s32.totalorder %s384_s3, %s384_s3 }
  0x12   :  { %314 = vmatprep.mubr.f32.mxu0 %v475_v0  ;;  %v137_v7 = vsub.s32 1, %v128_v6  ;;  %v129_v8 = vadd.s32 8, %v128_v6  ;;  %v133_v10 = vsub.s32 0, %v128_v6  ;;  %p451_p5 = scmp.ne.s32.totalorder %s384_s3, %s450_s4  ;;  %p456_p7 = scmp.lt.s32.totalorder %s450_s4, %s450_s4 }
  0x14   :  { %v138_v11 = vrot.slane %v130_v9, %v137_v7  ;;  %v134_v13 = vrot.slane %v130_v9, %v133_v10  ;;  %v151_v14 = vrot.slane %v143_v12, %v137_v7  ;;  %v147_v15 = vrot.slane %v143_v12, %v133_v10  ;;  %p457_p8 = por %p456_p7, %p455_p6 }
  0x16   :  { %vm142_vm2 = vcmp.eq.s32.totalorder %v129_v8, %v138_v11  ;;  %vm140_vm3 = vcmp.eq.s32.totalorder %v128_v6, %v138_v11  ;;  %vm141_vm4 = vcmp.eq.s32.totalorder %v129_v8, %v134_v13  ;;  %vm155_vm5 = vcmp.eq.s32.totalorder %v129_v8, %v151_v14  ;;  %p458_p9 = pnand %p457_p8, %p451_p5 }
  0x17   :  { %410 = vmatprep.subr.msk.mxu0 %vm142_vm2, %v478_v16  ;;  %vm154_vm6 = vcmp.eq.s32.totalorder %v129_v8, %v147_v15  ;;  %vm139_vm7 = vcmp.eq.s32.totalorder %v128_v6, %v134_v13  ;;  %405 = vmatprep.subr.msk.mxu1 %vm155_vm5, %v478_v16  ;;  %vm153_vm8 = vcmp.eq.s32.totalorder %v128_v6, %v151_v14 }
  0x18   :  { %411 = vmatpush1.msk.msra.mxu0 %vm141_vm4, %v478_v16  ;;  %406 = vmatpush1.msk.msra.mxu1 %vm154_vm6, %v478_v16  ;;  %vm152_vm9 = vcmp.eq.s32.totalorder %v128_v6, %v147_v15 }
  0x19   :  { %412 = vmatprep.subr.msk.mxu0 %vm140_vm3, %v478_v16  ;;  %407 = vmatprep.subr.msk.mxu1 %vm153_vm8, %v478_v16 }
  0x1a   :  { %413 = vmatpush1.msk.msra.mxu0 %vm139_vm7, %v478_v16  ;;  %408 = vmatpush1.msk.msra.mxu1 %vm152_vm9, %v478_v16 }
  0x8b   :  { %v45_v17 = vpop.permute.xlu0 %44 }
  0xd1   :  { %v117_v18 = vpop.f32.mrf.mxu0 }
  0xd2   :  { %v118_v19 = vadd.f32 %v117_v18, %v45_v17 }
  0xd3   :  { %v421_v20 = vpop.f32.mrf.mxu0 }
  0xd4   :  { %122 = vst.msk [vmem:[#allocation2] sm:$0xf] %vm121_vm10, %v118_v19 }
  0xdb   :  { %v126_v21 = vld [vmem:[#allocation2] sm:$0xf] }
  0xdc   :  { %v370_v22 = vld [vmem:[#allocation2] sm:$0xf]  ;;  %v173_v23 = vrot.slane %v126_v21, 2  ;;  %414 = vmatmul.mubr.msk.f32.vlgmr.msra.gmra.mxu0 %vm174_vm11, %v126_v21 }
  0xdd   :  { %372 = vst.msk [vmem:[#allocation7] sm:$0xf] %vm121_vm10, %v370_v22 }
  0xde   :  { %409 = vmatmul.mubr.msk.f32.vlgmr.msra.gmra.mxu1 %vm174_vm11, %v173_v23 }
 0x19c   :  { %v316_v24 = vpop.f32.mrf.mxu0 }
 0x19e   :  { %v243_v25 = vpop.f32.mrf.mxu1  ;;  %v318_v27 = vpop.f32.mrf.mxu0 }
 0x19f   :  { %v317_v26 = vadd.f32 %v316_v24, %v243_v25 }
 0x1a0   :  { %v245_v28 = vpop.f32.mrf.mxu1 }
 0x1a1   :  { %v324_v29 = vrot.slane %v317_v26, %v133_v10  ;;  %v319_v30 = vadd.f32 %v318_v27, %v245_v28  ;;  %v342_v34 = vrot.slane %v317_v26, %v137_v7 }
 0x1a3   :  { %v328_v31 = vrot.slane %v319_v30, %v133_v10  ;;  %v346_v32 = vrot.slane %v319_v30, %v137_v7  ;;  %v331_v33 = vsel %vm154_vm6, %v324_v29, -1e+30  ;;  %v329_v36 = vsel %vm152_vm9, %v324_v29, -1e+30 }
 0x1a4   :  { %v347_v41 = vsel %vm152_vm9, %v342_v34, -1e+30  ;;  %v349_v44 = vsel %vm154_vm6, %v342_v34, -1e+30 }
 0x1a5   :  { %v332_v35 = vsel %vm155_vm5, %v328_v31, -1e+30  ;;  %v330_v37 = vsel %vm153_vm8, %v328_v31, -1e+30  ;;  %v348_v40 = vsel %vm153_vm8, %v346_v32, -1e+30 }
 0x1a6   :  { %v336_v38 = vmax.f32 %v331_v33, %v332_v35  ;;  %v333_v39 = vmax.f32 %v329_v36, %v330_v37  ;;  %v351_v42 = vmax.f32 %v347_v41, %v348_v40  ;;  %v350_v43 = vsel %vm155_vm5, %v346_v32, -1e+30 }
 0x1a7   :  { %v354_v45 = vmax.f32 %v349_v44, %v350_v43 }
 0x1a8   :  { %337 = vmax.xlane.f32.xlu1 %v336_v38  ;;  %334 = vmax.xlane.f32.xlu0 %v333_v39 }
 0x1ac   :  { %352 = vmax.xlane.f32.xlu1 %v351_v42 }
 0x1b0   :  { %355 = vmax.xlane.f32.xlu1 %v354_v45 }
 0x1b1   :  { %461 = shalt.err (!%p458_p9)
}
 0x1b2   :  { %386 = dma.vmem_to_hbm [thread:$0]  %s384_s3, 64, %s563_s5, [#allocation6]   ;;  %vm359_vm13 = vcmask 7168   ;;  %v357_v48 = vld [vmem:[#allocation3] sm:$0xff]  ;;  %v358_v53 = vld [vmem:[#allocation3 + $0x8] sm:$0xff] }
 0x231   :  { %v338_v47 = vpop.xlane.xlu1 %337  ;;  %v335_v49 = vpop.xlane.xlu0 %334 }
 0x235   :  { %v353_v50 = vpop.xlane.xlu1 %352 }
 0x236   :  { %v360_v51 = vsel %vm359_vm13, %v335_v49, %v353_v50 }
 0x237   :  { %v362_v52 = vmax.f32 %v357_v48, %v360_v51 }
 0x239   :  { %365 = vst.msk [vmem:[#allocation3] sm:$0xff] %vm123_vm12, %v362_v52  ;;  %v356_v54 = vpop.xlane.xlu1 %355 }
 0x23a   :  { %v361_v55 = vsel %vm359_vm13, %v338_v47, %v356_v54 }
 0x23b   :  { %v363_v56 = vmax.f32 %v358_v53, %v361_v55 }
 0x23d   :  { %366 = vst.msk [vmem:[#allocation3 + $0x8] sm:$0xff] %vm123_vm12, %v363_v56 }
 0x240   :  { %v373_v57 = vld [vmem:[#allocation3] sm:$0xff] }
 0x241   :  { %375 = vst.msk [vmem:[%s564_s6] sm:$0xff] %vm123_vm12, %v373_v57 }
 0x244   :  { %v374_v58 = vld [vmem:[#allocation3 + $0x8] sm:$0xff] }
 0x245   :  { %376 = vst.msk [vmem:[%s564_s6 + $0x8] sm:$0xff] %vm123_vm12, %v374_v58 }
 0x246   :  { %472 = dma.done.wait [#allocation6], 64  }
 0x247   :  { %473 = vsyncadd [#allocation6], 4294967232 }
 0x248   :  { %394 = vsyncpa [#allocation5], 1 }
 0x249   :  { %395 = vsyncpa [#allocation6], 1 }

</bundles_post_ra>
